<compile_context>
chip_gen: v7x
topology: tpu7x:2x2x1
jax: 0.10.0
libtpu: 0.0.40
codegen_flags: <defaults>
</compile_context>

<pallas_src>
import functools

import jax
import jax.numpy as jnp
from jax.experimental import pallas as pl
from jax.experimental.pallas import tpu as pltpu

LANES = 128
MAX_TILE_ROWS = 1024      # 1024 x 128 f32 tile = 512 KiB per input per buffer
NEG_PAD = -1.0e4          # sigmoid(NEG_PAD) == 0.0 exactly in f32, BCE term == 0


def _cdiv(a, b):
    return -(-a // b)


def _round_up(a, b):
    return _cdiv(a, b) * b


def _dice_bce_kernel(x_ref, t_ref, acc_ref, *, tile_rows):
    """Accumulates per-core partial sums into the resident output block:
         acc[0:8]   = sum(p * t)     acc[8:16]  = sum(p)
         acc[16:24] = sum(t)         acc[24:32] = sum(bce_elem)
       All kept vreg-shaped (8, 128); the cross-lane reduce is done in the wrapper.
    """
    i = pl.program_id(1)

    x = x_ref[...].astype(jnp.float32)
    t = t_ref[...].astype(jnp.float32)

    # Fused sigmoid + BCE-with-logits: one exp, one log, one divide per element.
    e = jnp.exp(-jnp.abs(x))                         # EUP
    p = jnp.where(x >= 0.0, 1.0, e) / (1.0 + e)      # == sigmoid(x)
    # bce_elem = max(x, 0) - x*t + log(1 + exp(-|x|))  (== torch BCE for non-saturated p)
    bce = jnp.maximum(x, 0.0) - x * t + jnp.log(1.0 + e)
    pt = p * t

    def fold(v):
        # (tile_rows, 128) -> (8, 128) partial sums; pure VPU vreg adds (no XLU).
        return jnp.sum(v.reshape(tile_rows // 8, 8, LANES), axis=0)

    @pl.when(i == 0)
    def _init():
        acc_ref[0:8, :] = fold(pt)
        acc_ref[8:16, :] = fold(p)
        acc_ref[16:24, :] = fold(t)
        acc_ref[24:32, :] = fold(bce)

    @pl.when(i != 0)
    def _accum():
        acc_ref[0:8, :] += fold(pt)
        acc_ref[8:16, :] += fold(p)
        acc_ref[16:24, :] += fold(t)
        acc_ref[24:32, :] += fold(bce)


def dice_bce_loss(inputs, targets, smooth=1.0, ncores=2):
    """Pallas implementation of DiceBCELoss.forward (inputs = raw logits)."""
    x = jnp.reshape(inputs, (-1,))
    t = jnp.reshape(targets, (-1,))
    n = x.shape[0]

    rows = max(1, _cdiv(n, LANES))
    tile_rows = min(MAX_TILE_ROWS, _round_up(rows, 8))
    total_tiles = _cdiv(rows, tile_rows)
    nc = ncores if total_tiles >= ncores else 1       # only split if enough tiles
    total_tiles = _round_up(total_tiles, nc)
    tiles_per_core = total_tiles // nc
    rows_padded = total_tiles * tile_rows
    n_pad = rows_padded * LANES

    pad = n_pad - n
    if pad:
        # Very negative logit padding -> sigmoid == 0 and bce_elem == 0 exactly,
        # so no per-element mask is needed inside the kernel.
        x = jnp.pad(x, (0, pad), constant_values=NEG_PAD)
        t = jnp.pad(t, (0, pad), constant_values=0)

    x2d = x.reshape(rows_padded, LANES)
    t2d = t.reshape(rows_padded, LANES)

    def in_map(c, i):
        return (c * tiles_per_core + i, 0)

    def out_map(c, i):
        return (c, 0)

    kernel = functools.partial(_dice_bce_kernel, tile_rows=tile_rows)

    partials = pl.pallas_call(
        kernel,
        out_shape=jax.ShapeDtypeStruct((nc * 32, LANES), jnp.float32),
        grid_spec=pltpu.PrefetchScalarGridSpec(
            num_scalar_prefetch=0,
            grid=(nc, tiles_per_core),
            in_specs=[
                pl.BlockSpec((tile_rows, LANES), in_map),
                pl.BlockSpec((tile_rows, LANES), in_map),
            ],
            out_specs=pl.BlockSpec((32, LANES), out_map),
        ),
        compiler_params=pltpu.CompilerParams(
            dimension_semantics=("parallel", "arbitrary"),
        ),
    )(x2d, t2d)

    # Tiny final reduction + scalar finalize on (nc, 4, 8, 128) partials.
    sums = jnp.sum(partials.reshape(nc, 4, 8, LANES), axis=(0, 2, 3))
    inter, sum_p, sum_t, bce_sum = sums[0], sums[1], sums[2], sums[3]
    dice_loss = 1.0 - (2.0 * inter + smooth) / (sum_p + sum_t + smooth)
    bce_mean = bce_sum / jnp.float32(n)
    return bce_mean + dice_loss


def _reference(inputs, targets, smooth=1.0):
    # Matches torch: BCE(sigmoid(x), t, reduction='mean') + dice, log clamped at -100.
    p = jax.nn.sigmoid(inputs.astype(jnp.float32)).reshape(-1)
    t = targets.astype(jnp.float32).reshape(-1)
    inter = jnp.sum(p * t)
    dice = 1.0 - (2.0 * inter + smooth) / (jnp.sum(p) + jnp.sum(t) + smooth)
    log_p = jnp.maximum(jnp.log(p), -100.0)
    log_1mp = jnp.maximum(jnp.log(1.0 - p), -100.0)
    bce = jnp.mean(-(t * log_p + (1.0 - t) * log_1mp))
    return bce + dice


if __name__ == "__main__":
    key = jax.random.PRNGKey(0)
    k1, k2 = jax.random.split(key)
    # NCHW, consistent with a segmentation-style use of DiceBCELoss.
    B, C, H, W = 2, 4, 16, 16
    logits = jax.random.normal(k1, (B, C, H, W), dtype=jnp.float32)
    targets = (jax.random.uniform(k2, (B, C, H, W)) > 0.5).astype(jnp.float32)

    loss = dice_bce_loss(logits, targets, smooth=1.0)
    loss = jax.block_until_ready(loss)

    ref = _reference(logits, targets, smooth=1.0)
    assert jnp.allclose(loss, ref, rtol=1e-5, atol=1e-5), (loss, ref)
    print("KERNEL_OK")
</pallas_src>

<mosaic_0001>
module attributes {stable_mosaic.version = 11 : i64} {
  func.func @_dice_bce_kernel(%arg0: i32, %arg1: i32, %arg2: memref<16x128xf32, #tpu.memory_space<vmem>>, %arg3: memref<16x128xf32, #tpu.memory_space<vmem>>, %arg4: memref<32x128xf32, #tpu.memory_space<vmem>>) attributes {dimension_semantics = [#tpu.dimension_semantics<parallel>, #tpu.dimension_semantics<arbitrary>], iteration_bounds = array<i64: 1, 1>, scalar_prefetch = 0 : i64, scratch_operands = 0 : i64, tpu.core_type = #tpu.core_type<tc>, window_params = [{transform_indices = @transform_0, window_bounds = array<i64: 16, 128>}, {transform_indices = @transform_1, window_bounds = array<i64: 16, 128>}, {transform_indices = @transform_2, window_bounds = array<i64: 32, 128>}]} {
    %c0 = arith.constant 0 : index
    %c0_0 = arith.constant 0 : index
    %0 = vector.load %arg2[%c0, %c0_0] : memref<16x128xf32, #tpu.memory_space<vmem>>, vector<16x128xf32>
    %c0_1 = arith.constant 0 : index
    %c0_2 = arith.constant 0 : index
    %1 = vector.load %arg3[%c0_1, %c0_2] : memref<16x128xf32, #tpu.memory_space<vmem>>, vector<16x128xf32>
    %2 = math.absf %0 : vector<16x128xf32>
    %cst = arith.constant 0.000000e+00 : f32
    %3 = vector.broadcast %cst : f32 to vector<16x128xf32>
    %4 = arith.subf %3, %2 : vector<16x128xf32>
    %5 = math.exp %4 : vector<16x128xf32>
    %cst_3 = arith.constant 0.000000e+00 : f32
    %6 = vector.broadcast %cst_3 : f32 to vector<16x128xf32>
    %7 = arith.cmpf oge, %0, %6 : vector<16x128xf32>
    %cst_4 = arith.constant 1.000000e+00 : f32
    %8 = vector.broadcast %cst_4 : f32 to vector<16x128xf32>
    %9 = arith.select %7, %8, %5 : vector<16x128xi1>, vector<16x128xf32>
    %cst_5 = arith.constant 1.000000e+00 : f32
    %10 = vector.broadcast %cst_5 : f32 to vector<16x128xf32>
    %11 = arith.addf %10, %5 : vector<16x128xf32>
    %12 = arith.divf %9, %11 : vector<16x128xf32>
    %cst_6 = arith.constant 0.000000e+00 : f32
    %13 = vector.broadcast %cst_6 : f32 to vector<16x128xf32>
    %14 = arith.maximumf %0, %13 : vector<16x128xf32>
    %15 = arith.mulf %0, %1 : vector<16x128xf32>
    %16 = arith.subf %14, %15 : vector<16x128xf32>
    %cst_7 = arith.constant 1.000000e+00 : f32
    %17 = vector.broadcast %cst_7 : f32 to vector<16x128xf32>
    %18 = arith.addf %17, %5 : vector<16x128xf32>
    %19 = math.log %18 : vector<16x128xf32>
    %20 = arith.addf %16, %19 : vector<16x128xf32>
    %21 = arith.mulf %12, %1 : vector<16x128xf32>
    %c0_i32 = arith.constant 0 : i32
    %22 = arith.cmpi eq, %arg1, %c0_i32 : i32
    %23 = arith.extui %22 : i1 to i32
    %c0_i32_8 = arith.constant 0 : i32
    %24 = arith.cmpi ne, %23, %c0_i32_8 : i32
    scf.if %24 {
      %28 = vector.shape_cast %21 : vector<16x128xf32> to vector<2x8x128xf32>
      %cst_11 = arith.constant dense<0.000000e+00> : vector<8x128xf32>
      %29 = vector.multi_reduction <add>, %28, %cst_11 [0] : vector<2x8x128xf32> to vector<8x128xf32>
      %c0_12 = arith.constant 0 : index
      %c0_13 = arith.constant 0 : index
      %30 = vector.load %arg4[%c0_12, %c0_13] : memref<32x128xf32, #tpu.memory_space<vmem>>, vector<8x128xf32>
      tpu.vector_store %arg4[%c0_12, %c0_13], %29 {strides = array<i32>} : memref<32x128xf32, #tpu.memory_space<vmem>>, vector<8x128xf32>,
      %31 = vector.shape_cast %12 : vector<16x128xf32> to vector<2x8x128xf32>
      %cst_14 = arith.constant dense<0.000000e+00> : vector<8x128xf32>
      %32 = vector.multi_reduction <add>, %31, %cst_14 [0] : vector<2x8x128xf32> to vector<8x128xf32>
      %c8 = arith.constant 8 : index
      %c0_15 = arith.constant 0 : index
      %33 = vector.load %arg4[%c8, %c0_15] : memref<32x128xf32, #tpu.memory_space<vmem>>, vector<8x128xf32>
      tpu.vector_store %arg4[%c8, %c0_15], %32 {strides = array<i32>} : memref<32x128xf32, #tpu.memory_space<vmem>>, vector<8x128xf32>,
      %34 = vector.shape_cast %1 : vector<16x128xf32> to vector<2x8x128xf32>
      %cst_16 = arith.constant dense<0.000000e+00> : vector<8x128xf32>
      %35 = vector.multi_reduction <add>, %34, %cst_16 [0] : vector<2x8x128xf32> to vector<8x128xf32>
      %c16 = arith.constant 16 : index
      %c0_17 = arith.constant 0 : index
      %36 = vector.load %arg4[%c16, %c0_17] : memref<32x128xf32, #tpu.memory_space<vmem>>, vector<8x128xf32>
      tpu.vector_store %arg4[%c16, %c0_17], %35 {strides = array<i32>} : memref<32x128xf32, #tpu.memory_space<vmem>>, vector<8x128xf32>,
      %37 = vector.shape_cast %20 : vector<16x128xf32> to vector<2x8x128xf32>
      %cst_18 = arith.constant dense<0.000000e+00> : vector<8x128xf32>
      %38 = vector.multi_reduction <add>, %37, %cst_18 [0] : vector<2x8x128xf32> to vector<8x128xf32>
      %c24 = arith.constant 24 : index
      %c0_19 = arith.constant 0 : index
      %39 = vector.load %arg4[%c24, %c0_19] : memref<32x128xf32, #tpu.memory_space<vmem>>, vector<8x128xf32>
      tpu.vector_store %arg4[%c24, %c0_19], %38 {strides = array<i32>} : memref<32x128xf32, #tpu.memory_space<vmem>>, vector<8x128xf32>,
    } else {
    }
    %c0_i32_9 = arith.constant 0 : i32
    %25 = arith.cmpi ne, %arg1, %c0_i32_9 : i32
    %26 = arith.extui %25 : i1 to i32
    %c0_i32_10 = arith.constant 0 : i32
    %27 = arith.cmpi ne, %26, %c0_i32_10 : i32
    scf.if %27 {
      %c0_11 = arith.constant 0 : index
      %c0_12 = arith.constant 0 : index
      %28 = vector.load %arg4[%c0_11, %c0_12] : memref<32x128xf32, #tpu.memory_space<vmem>>, vector<8x128xf32>
      %29 = vector.shape_cast %21 : vector<16x128xf32> to vector<2x8x128xf32>
      %cst_13 = arith.constant dense<0.000000e+00> : vector<8x128xf32>
      %30 = vector.multi_reduction <add>, %29, %cst_13 [0] : vector<2x8x128xf32> to vector<8x128xf32>
      %31 = arith.addf %28, %30 : vector<8x128xf32>
      %c0_14 = arith.constant 0 : index
      %c0_15 = arith.constant 0 : index
      %32 = vector.load %arg4[%c0_14, %c0_15] : memref<32x128xf32, #tpu.memory_space<vmem>>, vector<8x128xf32>
      tpu.vector_store %arg4[%c0_14, %c0_15], %31 {strides = array<i32>} : memref<32x128xf32, #tpu.memory_space<vmem>>, vector<8x128xf32>,
      %c8 = arith.constant 8 : index
      %c0_16 = arith.constant 0 : index
      %33 = vector.load %arg4[%c8, %c0_16] : memref<32x128xf32, #tpu.memory_space<vmem>>, vector<8x128xf32>
      %34 = vector.shape_cast %12 : vector<16x128xf32> to vector<2x8x128xf32>
      %cst_17 = arith.constant dense<0.000000e+00> : vector<8x128xf32>
      %35 = vector.multi_reduction <add>, %34, %cst_17 [0] : vector<2x8x128xf32> to vector<8x128xf32>
      %36 = arith.addf %33, %35 : vector<8x128xf32>
      %c8_18 = arith.constant 8 : index
      %c0_19 = arith.constant 0 : index
      %37 = vector.load %arg4[%c8_18, %c0_19] : memref<32x128xf32, #tpu.memory_space<vmem>>, vector<8x128xf32>
      tpu.vector_store %arg4[%c8_18, %c0_19], %36 {strides = array<i32>} : memref<32x128xf32, #tpu.memory_space<vmem>>, vector<8x128xf32>,
      %c16 = arith.constant 16 : index
      %c0_20 = arith.constant 0 : index
      %38 = vector.load %arg4[%c16, %c0_20] : memref<32x128xf32, #tpu.memory_space<vmem>>, vector<8x128xf32>
      %39 = vector.shape_cast %1 : vector<16x128xf32> to vector<2x8x128xf32>
      %cst_21 = arith.constant dense<0.000000e+00> : vector<8x128xf32>
      %40 = vector.multi_reduction <add>, %39, %cst_21 [0] : vector<2x8x128xf32> to vector<8x128xf32>
      %41 = arith.addf %38, %40 : vector<8x128xf32>
      %c16_22 = arith.constant 16 : index
      %c0_23 = arith.constant 0 : index
      %42 = vector.load %arg4[%c16_22, %c0_23] : memref<32x128xf32, #tpu.memory_space<vmem>>, vector<8x128xf32>
      tpu.vector_store %arg4[%c16_22, %c0_23], %41 {strides = array<i32>} : memref<32x128xf32, #tpu.memory_space<vmem>>, vector<8x128xf32>,
      %c24 = arith.constant 24 : index
      %c0_24 = arith.constant 0 : index
      %43 = vector.load %arg4[%c24, %c0_24] : memref<32x128xf32, #tpu.memory_space<vmem>>, vector<8x128xf32>
      %44 = vector.shape_cast %20 : vector<16x128xf32> to vector<2x8x128xf32>
      %cst_25 = arith.constant dense<0.000000e+00> : vector<8x128xf32>
      %45 = vector.multi_reduction <add>, %44, %cst_25 [0] : vector<2x8x128xf32> to vector<8x128xf32>
      %46 = arith.addf %43, %45 : vector<8x128xf32>
      %c24_26 = arith.constant 24 : index
      %c0_27 = arith.constant 0 : index
      %47 = vector.load %arg4[%c24_26, %c0_27] : memref<32x128xf32, #tpu.memory_space<vmem>>, vector<8x128xf32>
      tpu.vector_store %arg4[%c24_26, %c0_27], %46 {strides = array<i32>} : memref<32x128xf32, #tpu.memory_space<vmem>>, vector<8x128xf32>,
    } else {
    }
    return
  }
  func.func @transform_0(%arg0: i32, %arg1: i32) -> (i32, i32) {
    %c1_i32 = arith.constant 1 : i32
    %0 = arith.muli %arg0, %c1_i32 : i32
    %1 = arith.addi %0, %arg1 : i32
    %c0_i32 = arith.constant 0 : i32
    %c0_i32_0 = arith.constant 0 : i32
    return %1, %c0_i32 : i32, i32
  }
  func.func @transform_1(%arg0: i32, %arg1: i32) -> (i32, i32) {
    %c1_i32 = arith.constant 1 : i32
    %0 = arith.muli %arg0, %c1_i32 : i32
    %1 = arith.addi %0, %arg1 : i32
    %c0_i32 = arith.constant 0 : i32
    %c0_i32_0 = arith.constant 0 : i32
    return %1, %c0_i32 : i32, i32
  }
  func.func @transform_2(%arg0: i32, %arg1: i32) -> (i32, i32) {
    %c0_i32 = arith.constant 0 : i32
    %c0_i32_0 = arith.constant 0 : i32
    return %arg0, %c0_i32 : i32, i32
  }
}

</mosaic_0001>

<bundles_post_ra>
// kernel: tpu_custom_call.1
= control target key start
LH: loop header
LB: loop body
LE: loop exit
PB: predicated region body
PF: predicated region fallthrough
CT: control target
= control target key end

     0   :  { %7 = vsyncpa [#allocation3], 0  ;;  %s292_s0 = inlined_call_operand.hbm [shape: f32[16,128], index: 0, kind: input, shape index: {}]   ;;  %s293_s1 = inlined_call_operand.hbm [shape: f32[16,128], index: 1, kind: input, shape index: {}]   ;;  %s294_s2 = inlined_call_operand.hbm [shape: f32[32,128], index: 2, kind: output, shape index: {}]  }
   0x1   :  { %8 = vsyncpa [#allocation6], 0 }
   0x2   :  { %9 = vsyncpa [#allocation4], 0  ;;  %s227_s9 = smov [#allocation2]   ;;  %s155_s13 = scalar_lea.hbm %s292_s0, 256 }
   0x3   :  { %s19_s10 = sshll.u32 %s227_s9, 4  ;;  %p156_p0 = scmp.ne.s32.totalorder %s292_s0, %s155_s13  ;;  %s20_s10 = int_to_ptr.vmem [resolvable:$true] %s19_s10 }
   0x4   :  { %p159_p1 = scmp.lt.u32.totalorder %s155_s13, %s292_s0 }
   0x6   :  { %p161_p2 = pnand %p159_p1, %p156_p0 }
   0x8   :  { %164 = shalt.err (!%p161_p2)
}
   0x9   :  { %s165_s18 = scalar_lea.vmem %s20_s10, 256  ;;  %p170_p4 = scmp.lt.s32.totalorder %s20_s10, %s20_s10 }
   0xa   :  { %p166_p3 = scmp.ne.s32.totalorder %s20_s10, %s165_s18  ;;  %p171_p5 = scmp.lt.s32.totalorder %s165_s18, %s165_s18 }
   0xc   :  { %p172_p6 = por %p171_p5, %p170_p4 }
   0xe   :  { %p173_p7 = pnand %p172_p6, %p166_p3 }
  0x10   :  { %176 = shalt.err (!%p173_p7)
}
  0x11   :  { %s228_s19 = smov 128   ;;  %s229_s20 = smov 8  }
  0x12   :  { %25 = dma.hbm_to_vmem [thread:$0]  %s292_s0, 256, %s20_s10, [#allocation3], %s228_s19, %s228_s19, %s229_s20  }
  0x13   :  { %s230_s23 = smov [#allocation5]   ;;  %s177_s27 = scalar_lea.hbm %s293_s1, 256 }
  0x14   :  { %s35_s24 = sshll.u32 %s230_s23, 4  ;;  %p178_p8 = scmp.ne.s32.totalorder %s293_s1, %s177_s27  ;;  %s36_s24 = int_to_ptr.vmem [resolvable:$true] %s35_s24 }
  0x15   :  { %p181_p9 = scmp.lt.u32.totalorder %s177_s27, %s293_s1 }
  0x17   :  { %p183_p10 = pnand %p181_p9, %p178_p8 }
  0x19   :  { %186 = shalt.err (!%p183_p10)
}
  0x1a   :  { %s187_s4 = scalar_lea.vmem %s36_s24, 256  ;;  %p192_p12 = scmp.lt.s32.totalorder %s36_s24, %s36_s24 }
  0x1b   :  { %p188_p11 = scmp.ne.s32.totalorder %s36_s24, %s187_s4  ;;  %p193_p13 = scmp.lt.s32.totalorder %s187_s4, %s187_s4 }
  0x1d   :  { %p194_p0 = por %p193_p13, %p192_p12 }
  0x1f   :  { %p195_p1 = pnand %p194_p0, %p188_p11 }
  0x21   :  { %198 = shalt.err (!%p195_p1)
}
  0x22   :  { %41 = dma.hbm_to_vmem [thread:$0]  %s293_s1, 256, %s36_s24, [#allocation6], %s228_s19, %s228_s19, %s229_s20  }
  0x23   :  { %221 = dma.done.wait [#allocation3], 256  }
  0x24   :  { %222 = vsyncadd [#allocation3], 4294967040 }
  0x25   :  { %223 = dma.done.wait [#allocation6], 256  }
  0x26   :  { %224 = vsyncadd [#allocation6], 4294967040  ;;  %v52_v0 = vld [vmem:[#allocation2] sm:$0xff]  ;;  %v53_v1 = vld [vmem:[#allocation2 + $0x8] sm:$0xff]  ;;  %s231_s1 = smov [#allocation7]  }
  0x27   :  { %v54_v2 = vld [vmem:[#allocation5] sm:$0xff]  ;;  %v55_v3 = vld [vmem:[#allocation5 + $0x8] sm:$0xff]  ;;  %v56_v4 = vand.u32 2147483647, %v52_v0  ;;  %v57_v5 = vand.u32 2147483647, %v53_v1 }
  0x28   :  { %v96_v6 = vadd.f32 %v55_v3, %v54_v2  ;;  %vm64_vm0 = vcmp.ge.f32.partialorder %v52_v0, 0.0  ;;  %vm65_vm1 = vcmp.ge.f32.partialorder %v53_v1, 0.0  ;;  %v74_v15 = vmax.f32 %v52_v0, 0.0  ;;  %s125_s6 = sshll.u32 %s231_s1, 4  ;;  %s126_s6 = int_to_ptr.vmem [resolvable:$true] %s125_s6 }
  0x29   :  { %v58_v7 = vsub.f32 0.0, %v56_v4  ;;  %v59_v8 = vsub.f32 0.0, %v57_v5  ;;  %v76_v16 = vmul.f32 %v54_v2, %v52_v0  ;;  %v75_v18 = vmax.f32 %v53_v1, 0.0  ;;  %s199_s7 = scalar_lea.vmem %s126_s6, 512  ;;  %p204_p3 = scmp.lt.s32.totalorder %s126_s6, %s126_s6 }
  0x2a   :  { %97 = vst [vmem:[#allocation7 + $0x10] sm:$0xff] %v96_v6  ;;  %v77_v19 = vmul.f32 %v55_v3, %v53_v1  ;;  %p200_p2 = scmp.ne.s32.totalorder %s126_s6, %s199_s7  ;;  %p205_p4 = scmp.lt.s32.totalorder %s199_s7, %s199_s7 }
  0x2b   :  { %v60_v9 = vmul.f32 1.442695, %v58_v7  ;;  %v62_v10 = vmul.f32 1.442695, %v59_v8  ;;  %v78_v24 = vsub.f32 %v74_v15, %v76_v16 }
  0x2c   :  { %v79_v27 = vsub.f32 %v75_v18, %v77_v19  ;;  %p206_p5 = por %p205_p4, %p204_p3 }
  0x2d   :  { %143 = vpow2.f32 %v60_v9 }
  0x2e   :  { %145 = vpow2.f32 %v62_v10  ;;  %p207_p6 = pnand %p206_p5, %p200_p2 }
  0x37   :  { %v144_v11 = vpop.eup %143 }
  0x38   :  { %v146_v12 = vpop.eup %145  ;;  %v68_v13 = vadd.f32 1.0, %v144_v11  ;;  %v66_v17 = vsel %vm64_vm0, 1.0, %v144_v11 }
  0x39   :  { %v69_v14 = vadd.f32 1.0, %v146_v12  ;;  %v67_v20 = vsel %vm65_vm1, 1.0, %v146_v12 }
  0x3a   :  { %147 = vrcp.f32 %v68_v13 }
  0x3b   :  { %149 = vrcp.f32 %v69_v14 }
  0x3c   :  { %151 = vlog2.f32 %v68_v13 }
  0x3d   :  { %153 = vlog2.f32 %v69_v14 }
  0x44   :  { %v148_v21 = vpop.eup %147 }
  0x45   :  { %v150_v22 = vpop.eup %149  ;;  %v71_v23 = vmul.f32 %v148_v21, %v66_v17 }
  0x46   :  { %v152_v25 = vpop.eup %151  ;;  %v73_v26 = vmul.f32 %v150_v22, %v67_v20 }
  0x47   :  { %v154_v28 = vpop.eup %153  ;;  %v86_v29 = vmul.f32 %v71_v23, %v54_v2  ;;  %v81_v30 = vmul.f32 0.6931472, %v152_v25 }
  0x48   :  { %v87_v31 = vmul.f32 %v73_v26, %v55_v3  ;;  %v94_v32 = vadd.f32 %v73_v26, %v71_v23  ;;  %v83_v33 = vmul.f32 0.6931472, %v154_v28 }
  0x49   :  { %v84_v34 = vadd.f32 %v81_v30, %v78_v24 }
  0x4a   :  { %v92_v35 = vadd.f32 %v87_v31, %v86_v29  ;;  %95 = vst [vmem:[#allocation7 + $0x8] sm:$0xff] %v94_v32  ;;  %v85_v36 = vadd.f32 %v83_v33, %v79_v27 }
  0x4c   :  { %93 = vst [vmem:[#allocation7] sm:$0xff] %v92_v35  ;;  %v98_v37 = vadd.f32 %v85_v36, %v84_v34 }
  0x4e   :  { %99 = vst [vmem:[#allocation7 + $0x18] sm:$0xff] %v98_v37 }
  0x4f   :  { %210 = shalt.err (!%p207_p6)
}
  0x50   :  { %s211_s10 = scalar_lea.hbm %s294_s2, 512 }
  0x51   :  { %p212_p7 = scmp.ne.s32.totalorder %s294_s2, %s211_s10  ;;  %p215_p8 = scmp.lt.u32.totalorder %s211_s10, %s294_s2 }
  0x53   :  { %p217_p9 = pnand %p215_p8, %p212_p7 }
  0x55   :  { %220 = shalt.err (!%p217_p9)
}
  0x56   :  { %131 = dma.vmem_to_hbm [thread:$0]  %s126_s6, 512, %s294_s2, [#allocation4], %s228_s19, %s228_s19, %s229_s20  }
  0x57   :  { %225 = dma.done.wait [#allocation4], 512  }
  0x58   :  { %226 = vsyncadd [#allocation4], 4294966784 }
  0x59   :  { %135 = vsyncpa [#allocation3], 1 }
  0x5a   :  { %136 = vsyncpa [#allocation6], 1 }
  0x5b   :  { %137 = vsyncpa [#allocation4], 1 }

</bundles_post_ra>
